<compile_context>
chip_gen: v5e
topology: v5e:2x2
jax: 0.10.0
libtpu: 0.0.40
codegen_flags: <defaults>
</compile_context>

<pallas_src>
import functools

import jax
import jax.numpy as jnp
from jax import lax
from jax.experimental import pallas as pl
from jax.experimental.pallas import tpu as pltpu


# ----------------------------- Pallas kernel --------------------------------
def _attn_kernel(x_ref, wt_ref, phip_ref, gaug_ref, wo_ref, out_ref, *, compute_dtype):
    # Per-(batch, query-tile) shapes:
    #   x_ref    : (C, TQ)        f32   channel-major input tile (lane axis = HW, dense)
    #   wt_ref   : (C/8, C)       cdt   theta 1x1-conv weight (torch (out, in) layout)
    #   phip_ref : (C/8, HW4)     cdt   2x2-max-pooled phi, lane-dense (keys on lanes)
    #   gaug_ref : (C/2 + 1, HW4) cdt   pooled g with a trailing row of ones
    #   wo_ref   : (C, C/2)       cdt   gamma-scaled output 1x1-conv weight
    #   out_ref  : (C, TQ)        f32
    c2 = gaug_ref.shape[0] - 1
    approx = compute_dtype != jnp.float32

    x = x_ref[...]                                                   # (C, TQ)  f32
    xc = x.astype(compute_dtype)

    # theta projection on the MXU, f32 accumulation.
    theta = jnp.dot(wt_ref[...], xc,
                    preferred_element_type=jnp.float32)              # (C8, TQ) f32

    # scores^T[m, n] = <phi_p[:, m], theta[:, n]> : contract dim 0 of both operands so
    # both MXU inputs stay lane-dense (keys on sublanes, queries on lanes).
    scores_t = lax.dot_general(
        phip_ref[...], theta.astype(compute_dtype),
        dimension_numbers=(((0,), (0,)), ((), ())),
        preferred_element_type=jnp.float32)                          # (HW4, TQ) f32

    # Numerically stable exp; on the bf16 path the exp argument is bf16 (bf16 EUP on
    # v6e/v7x) and e feeds the aggregation matmul directly, no extra cast pass.
    m = jnp.max(scores_t, axis=0, keepdims=True)                     # (1, TQ)
    e = jnp.exp((scores_t - m).astype(compute_dtype))                # (HW4, TQ) cdt

    # Fused aggregation: the last row of gaug is ones, so the softmax denominator comes
    # out of the same matmul (f32 accumulation) for free.
    o_aug = jnp.dot(gaug_ref[...], e,
                    preferred_element_type=jnp.float32)              # (C2+1, TQ) f32
    inv = pl.reciprocal(o_aug[c2:c2 + 1, :], approx=approx)          # (1, TQ)
    o_mid = o_aug[:c2, :] * inv                                      # (C2, TQ) f32

    # Output 1x1 conv (gamma already folded into wo by the wrapper).
    o = jnp.dot(wo_ref[...], o_mid.astype(compute_dtype),
                preferred_element_type=jnp.float32)                  # (C, TQ) f32

    # Residual kept in f32: exact identity when gamma == 0.
    out_ref[...] = o + x


def _query_tile(hw):
    """Largest query tile <= 512 lanes that divides HW (full HW if none / small maps)."""
    if hw <= 512:
        return hw
    for t in (512, 384, 256, 128):
        if hw % t == 0:
            return t
    return hw


# ------------------------------ wrapper --------------------------------------
@functools.partial(jax.jit, static_argnames=("compute_dtype",))
def attention_pallas(x_nchw, wt, wp, wg, wo, gamma, *, compute_dtype=jnp.bfloat16):
    """x_nchw: (B, C, H, W) f32.  Weights in torch (out, in) layout.  Returns NCHW f32."""
    B, C, H, W = x_nchw.shape
    assert C % 8 == 0 and H % 2 == 0 and W % 2 == 0, "need C % 8 == 0 and even H, W"
    H2, W2 = H // 2, W // 2
    HW, HW4 = H * W, H2 * W2
    C8, C2 = C // 8, C // 2

    x32 = x_nchw.astype(jnp.float32)
    x_cm = x32.reshape(B, C, HW)           # channel-major; free reshape, no HBM permute

    # Fused phi+g projection (single extra HBM read of x), computed in compute_dtype, then
    # the 2x2 max pool (max commutes with the monotone rounding to bf16).
    w_pg = jnp.concatenate([wp, wg], axis=0).astype(compute_dtype)        # (C8+C2, C)
    pg = jnp.einsum("oc,bchw->bohw", w_pg,
                    x_nchw.astype(compute_dtype))                         # (B, C8+C2, H, W)
    pg = pg.reshape(B, C8 + C2, H2, 2, W2, 2).max(axis=(3, 5))            # (B, C8+C2, H2, W2)
    pg = pg.reshape(B, C8 + C2, HW4)
    phi_p = pg[:, :C8, :]                                                 # (B, C8, HW4)
    g_aug = jnp.concatenate(
        [pg[:, C8:, :], jnp.ones((B, 1, HW4), compute_dtype)], axis=1)    # (B, C2+1, HW4)

    # Fold gamma into the output weight: the kernel epilogue is `o + x`, and gamma == 0
    # still gives an exactly-identity output (zero weights -> exactly-zero MXU result).
    wo_scaled = (jnp.asarray(gamma, jnp.float32) * wo).astype(compute_dtype)
    wt_c = wt.astype(compute_dtype)

    TQ = _query_tile(HW)
    NQ = HW // TQ

    kernel = functools.partial(_attn_kernel, compute_dtype=compute_dtype)

    out_cm = pl.pallas_call(
        kernel,
        out_shape=jax.ShapeDtypeStruct((B, C, HW), jnp.float32),
        grid=(B, NQ),
        in_specs=[
            pl.BlockSpec((None, C, TQ), lambda b, q: (b, 0, q)),          # x query tile
            pl.BlockSpec((C8, C), lambda b, q: (0, 0)),                   # Wt (resident)
            pl.BlockSpec((None, C8, HW4), lambda b, q: (b, 0, 0)),        # pooled phi
            pl.BlockSpec((None, C2 + 1, HW4), lambda b, q: (b, 0, 0)),    # pooled g + ones
            pl.BlockSpec((C, C2), lambda b, q: (0, 0)),                   # gamma * Wo
        ],
        out_specs=pl.BlockSpec((None, C, TQ), lambda b, q: (b, 0, q)),
        compiler_params=pltpu.CompilerParams(
            dimension_semantics=("parallel", "parallel"),
            vmem_limit_bytes=32 * 1024 * 1024,
        ),
    )(x_cm, wt_c, phi_p, g_aug, wo_scaled)

    return out_cm.reshape(B, C, H, W)


# --------------------------- pure-JAX reference ------------------------------
def attention_ref(x, wt, wp, wg, wo, gamma):
    B, C, H, W = x.shape
    theta = jnp.einsum("oc,bchw->bohw", wt, x)
    phi = jnp.einsum("oc,bchw->bohw", wp, x)
    g = jnp.einsum("oc,bchw->bohw", wg, x)

    def pool(t):
        b, c, h, w = t.shape
        return t.reshape(b, c, h // 2, 2, w // 2, 2).max(axis=(3, 5))

    phi = pool(phi)
    g = pool(g)
    theta = theta.reshape(B, C // 8, H * W)
    phi = phi.reshape(B, C // 8, -1)
    g = g.reshape(B, C // 2, -1)
    beta = jax.nn.softmax(jnp.einsum("bcn,bcm->bnm", theta, phi), axis=-1)
    o = jnp.einsum("bcm,bnm->bcn", g, beta).reshape(B, C // 2, H, W)
    o = jnp.einsum("oc,bchw->bohw", wo, o)
    return gamma * o + x


# ------------------------------ param init -----------------------------------
def _orth_sn(key, out_c, in_c):
    # Orthogonal init (gain=1) of the (out_c, in_c) 1x1-conv weight, followed by spectral
    # normalization.  torch uses one power-iteration step; here the exact top singular
    # value (== 1 for an orthogonal matrix) is used, which is deterministic.
    a = jax.random.normal(key, (max(out_c, in_c), min(out_c, in_c)), jnp.float32)
    q, _ = jnp.linalg.qr(a)
    w = q if out_c >= in_c else q.T                # shape (out_c, in_c)
    sigma = jnp.linalg.svd(w, compute_uv=False)[0]
    return w / sigma


if __name__ == "__main__":
    B, C, H, W = 2, 32, 16, 16   # channels must be divisible by 8; H, W even

    key = jax.random.PRNGKey(0)
    k1, k2, k3, k4, kx = jax.random.split(key, 5)
    wt = _orth_sn(k1, C // 8, C)
    wp = _orth_sn(k2, C // 8, C)
    wg = _orth_sn(k3, C // 2, C)
    wo = _orth_sn(k4, C, C // 2)
    x = jax.random.normal(kx, (B, C, H, W), jnp.float32)

    # 1) Module-faithful forward: gamma is initialized to 0.0, so output == input exactly
    #    (gamma folded into Wo -> exactly-zero attention branch; residual kept in f32).
    out0 = attention_pallas(x, wt, wp, wg, wo, 0.0)
    jax.block_until_ready(out0)
    assert jnp.allclose(out0, x, atol=1e-6, rtol=0.0), float(jnp.max(jnp.abs(out0 - x)))

    # 2) Strict correctness of the kernel math: f32 compute path, gamma = 1.0.
    ref1 = attention_ref(x, wt, wp, wg, wo, 1.0)
    out_f32 = attention_pallas(x, wt, wp, wg, wo, 1.0, compute_dtype=jnp.float32)
    jax.block_until_ready(out_f32)
    assert jnp.allclose(out_f32, ref1, atol=5e-4, rtol=5e-4), (
        float(jnp.max(jnp.abs(out_f32 - ref1))))

    # 3) Default bf16 fast path: looser tolerance (bf16 MXU operands / bf16 exp argument,
    #    f32 accumulation everywhere).
    out_bf16 = attention_pallas(x, wt, wp, wg, wo, 1.0)
    jax.block_until_ready(out_bf16)
    assert jnp.allclose(out_bf16, ref1, atol=2e-1, rtol=1e-1), (
        float(jnp.max(jnp.abs(out_bf16 - ref1))))

    print("KERNEL_OK")
</pallas_src>

<mosaic_0001>
module attributes {stable_mosaic.version = 11 : i64} {
  func.func @_attn_kernel(%arg0: i32, %arg1: i32, %arg2: memref<1x32x256xf32, #tpu.memory_space<vmem>>, %arg3: memref<4x32xbf16, #tpu.memory_space<vmem>>, %arg4: memref<1x4x64xbf16, #tpu.memory_space<vmem>>, %arg5: memref<1x17x64xbf16, #tpu.memory_space<vmem>>, %arg6: memref<32x16xbf16, #tpu.memory_space<vmem>>, %arg7: memref<1x32x256xf32, #tpu.memory_space<vmem>>) attributes {dimension_semantics = [#tpu.dimension_semantics<parallel>, #tpu.dimension_semantics<parallel>], iteration_bounds = array<i64: 2, 1>, scalar_prefetch = 0 : i64, scratch_operands = 0 : i64, tpu.core_type = #tpu.core_type<tc>, window_params = [{transform_indices = @transform_0, window_bounds = array<i64: 1, 32, 256>}, {pipeline_mode = #tpu.pipeline_mode<synchronous>, transform_indices = @transform_1, window_bounds = array<i64: 4, 32>}, {transform_indices = @transform_2, window_bounds = array<i64: 1, 4, 64>}, {transform_indices = @transform_3, window_bounds = array<i64: 1, 17, 64>}, {pipeline_mode = #tpu.pipeline_mode<synchronous>, transform_indices = @transform_4, window_bounds = array<i64: 32, 16>}, {transform_indices = @transform_5, window_bounds = array<i64: 1, 32, 256>}]} {
    %c0 = arith.constant 0 : index
    %c0_0 = arith.constant 0 : index
    %c0_1 = arith.constant 0 : index
    %0 = vector.load %arg2[%c0, %c0_0, %c0_1] : memref<1x32x256xf32, #tpu.memory_space<vmem>>, vector<1x32x256xf32>
    %1 = vector.shape_cast %0 : vector<1x32x256xf32> to vector<32x256xf32>
    %2 = arith.truncf %1 : vector<32x256xf32> to vector<32x256xbf16>
    %c0_2 = arith.constant 0 : index
    %c0_3 = arith.constant 0 : index
    %3 = vector.load %arg3[%c0_2, %c0_3] : memref<4x32xbf16, #tpu.memory_space<vmem>>, vector<4x32xbf16>
    %cst = arith.constant dense<0.000000e+00> : vector<4x256xf32>
    %4 = tpu.matmul %3, %2, %cst {dimension_numbers = #tpu.dot_dimension_numbers<[1], [0], [0], [1], [0, 0, 1, 1], [], []>} : vector<4x32xbf16>, vector<32x256xbf16>, vector<4x256xf32> -> vector<4x256xf32>
    %c0_4 = arith.constant 0 : index
    %c0_5 = arith.constant 0 : index
    %c0_6 = arith.constant 0 : index
    %5 = vector.load %arg4[%c0_4, %c0_5, %c0_6] : memref<1x4x64xbf16, #tpu.memory_space<vmem>>, vector<1x4x64xbf16>
    %6 = vector.shape_cast %5 : vector<1x4x64xbf16> to vector<4x64xbf16>
    %7 = arith.truncf %4 : vector<4x256xf32> to vector<4x256xbf16>
    %cst_7 = arith.constant dense<0.000000e+00> : vector<64x256xf32>
    %8 = tpu.matmul %6, %7, %cst_7 {dimension_numbers = #tpu.dot_dimension_numbers<[0], [0], [1], [1], [0, 1, 1, 1], [], []>} : vector<4x64xbf16>, vector<4x256xbf16>, vector<64x256xf32> -> vector<64x256xf32>
    %cst_8 = arith.constant dense<0xFF800000> : vector<256xf32>
    %9 = vector.multi_reduction <maximumf>, %8, %cst_8 [0] : vector<64x256xf32> to vector<256xf32>
    %10 = vector.shape_cast %9 : vector<256xf32> to vector<1x256xf32>
    %11 = vector.broadcast %10 : vector<1x256xf32> to vector<64x256xf32>
    %12 = arith.subf %8, %11 : vector<64x256xf32>
    %13 = arith.truncf %12 : vector<64x256xf32> to vector<64x256xbf16>
    %14 = math.exp %13 : vector<64x256xbf16>
    %c0_9 = arith.constant 0 : index
    %c0_10 = arith.constant 0 : index
    %c0_11 = arith.constant 0 : index
    %15 = vector.load %arg5[%c0_9, %c0_10, %c0_11] : memref<1x17x64xbf16, #tpu.memory_space<vmem>>, vector<1x17x64xbf16>
    %16 = vector.shape_cast %15 : vector<1x17x64xbf16> to vector<17x64xbf16>
    %cst_12 = arith.constant dense<0.000000e+00> : vector<17x256xf32>
    %17 = tpu.matmul %16, %14, %cst_12 {dimension_numbers = #tpu.dot_dimension_numbers<[1], [0], [0], [1], [0, 0, 1, 1], [], []>} : vector<17x64xbf16>, vector<64x256xbf16>, vector<17x256xf32> -> vector<17x256xf32>
    %18 = vector.extract_strided_slice %17 {offsets = [16, 0], sizes = [1, 256], strides = [1, 1]} : vector<17x256xf32> to vector<1x256xf32>
    %19 = tpu.reciprocal %18 {approx = true} : vector<1x256xf32> -> vector<1x256xf32>
    %20 = vector.extract_strided_slice %17 {offsets = [0, 0], sizes = [16, 256], strides = [1, 1]} : vector<17x256xf32> to vector<16x256xf32>
    %21 = vector.broadcast %19 : vector<1x256xf32> to vector<16x256xf32>
    %22 = arith.mulf %20, %21 : vector<16x256xf32>
    %c0_13 = arith.constant 0 : index
    %c0_14 = arith.constant 0 : index
    %23 = vector.load %arg6[%c0_13, %c0_14] : memref<32x16xbf16, #tpu.memory_space<vmem>>, vector<32x16xbf16>
    %24 = arith.truncf %22 : vector<16x256xf32> to vector<16x256xbf16>
    %cst_15 = arith.constant dense<0.000000e+00> : vector<32x256xf32>
    %25 = tpu.matmul %23, %24, %cst_15 {dimension_numbers = #tpu.dot_dimension_numbers<[1], [0], [0], [1], [0, 0, 1, 1], [], []>} : vector<32x16xbf16>, vector<16x256xbf16>, vector<32x256xf32> -> vector<32x256xf32>
    %26 = arith.addf %25, %1 : vector<32x256xf32>
    %c0_16 = arith.constant 0 : index
    %c0_17 = arith.constant 0 : index
    %c0_18 = arith.constant 0 : index
    %27 = vector.load %arg7[%c0_16, %c0_17, %c0_18] : memref<1x32x256xf32, #tpu.memory_space<vmem>>, vector<1x32x256xf32>
    %28 = vector.shape_cast %27 : vector<1x32x256xf32> to vector<32x256xf32>
    %29 = vector.shape_cast %26 : vector<32x256xf32> to vector<1x32x256xf32>
    tpu.vector_store %arg7[%c0_16, %c0_17, %c0_18], %29 {strides = array<i32>} : memref<1x32x256xf32, #tpu.memory_space<vmem>>, vector<1x32x256xf32>,
    return
  }
  func.func @transform_0(%arg0: i32, %arg1: i32) -> (i32, i32, i32) {
    %c0_i32 = arith.constant 0 : i32
    %c0_i32_0 = arith.constant 0 : i32
    return %arg0, %c0_i32, %arg1 : i32, i32, i32
  }
  func.func @transform_1(%arg0: i32, %arg1: i32) -> (i32, i32) {
    %c0_i32 = arith.constant 0 : i32
    %c0_i32_0 = arith.constant 0 : i32
    %c0_i32_1 = arith.constant 0 : i32
    return %c0_i32, %c0_i32_0 : i32, i32
  }
  func.func @transform_2(%arg0: i32, %arg1: i32) -> (i32, i32, i32) {
    %c0_i32 = arith.constant 0 : i32
    %c0_i32_0 = arith.constant 0 : i32
    %c0_i32_1 = arith.constant 0 : i32
    return %arg0, %c0_i32, %c0_i32_0 : i32, i32, i32
  }
  func.func @transform_3(%arg0: i32, %arg1: i32) -> (i32, i32, i32) {
    %c0_i32 = arith.constant 0 : i32
    %c0_i32_0 = arith.constant 0 : i32
    %c0_i32_1 = arith.constant 0 : i32
    return %arg0, %c0_i32, %c0_i32_0 : i32, i32, i32
  }
  func.func @transform_4(%arg0: i32, %arg1: i32) -> (i32, i32) {
    %c0_i32 = arith.constant 0 : i32
    %c0_i32_0 = arith.constant 0 : i32
    %c0_i32_1 = arith.constant 0 : i32
    return %c0_i32, %c0_i32_0 : i32, i32
  }
  func.func @transform_5(%arg0: i32, %arg1: i32) -> (i32, i32, i32) {
    %c0_i32 = arith.constant 0 : i32
    %c0_i32_0 = arith.constant 0 : i32
    return %arg0, %c0_i32, %arg1 : i32, i32, i32
  }
}

</mosaic_0001>

<bundles_post_ra>
// kernel: attention_pallas.1
= control target key start
LH: loop header
LB: loop body
LE: loop exit
PB: predicated region body
PF: predicated region fallthrough
CT: control target
= control target key end

     0   :  { %s962_s18 = smov 0   ;;  %s964_s19 = smov 0   ;;  %s1087_s0 = inlined_call_operand.vmem [shape: f32[2,32,256], index: 0, kind: input, shape index: {}]   ;;  %s1088_s1 = inlined_call_operand.vmem [shape: bf16[4,32], index: 1, kind: input, shape index: {}]   ;;  %s1089_s2 = inlined_call_operand.vmem [shape: bf16[2,4,64], index: 2, kind: input, shape index: {}]   ;;  %s1090_s3 = inlined_call_operand.vmem [shape: bf16[2,17,64], index: 3, kind: input, shape index: {}]   ;;  %s1091_s4 = inlined_call_operand.vmem [shape: bf16[32,16], index: 4, kind: input, shape index: {}]   ;;  %s1092_s5 = inlined_call_operand.vmem [shape: f32[2,32,256], index: 5, kind: output, shape index: {}]  }
   0x1   :  { %s966_s20 = smov 0  }
   0x2 LB: > { %s27_s21 = sadd.s32 1, %s926_s19  ;;  %p794_p0 = scmp.ge.s32.totalorder %s930_s20, 1  ;;  %s930_s20 = sphi %s966_s20, %s15_s20   ;;  %s926_s19 = sphi %s964_s19, %s1094_s19   ;;  %s922_s18 = sphi %s962_s18, %s1093_s18  }
   0x3   : > { %p29_p1 = scmp.ge.s32.totalorder %s27_s21, 2  ;;  %p227_p2 = scmp.lt.s32.totalorder %s930_s20, 3 }
   0x5   : > { %s1096_s21 = smov (%p29_p1, %s27_s21), 0  ;;  %p228_p3 = pnand %p794_p0, %p227_p2 }
   0x6   : > { %p273_p4 = scmp.lt.s32.totalorder (!%p228_p3), %s922_s18, 1 }
   0x7   : > { %231 = sbr.rel (%p228_p3) target bundleno = 729 (0x2d9), region = 40 }
   0xc   : > { %s1098_s18 = smov (!%p273_p4, %s922_s18), 1  ;;  %v314_v13 = vld [vmem:[%s1088_s1] sm:$0x3]  ;;  %vm315_vm0 = vcmask 261120   ;;  %vm377_vm1 = vcmask 1041408   ;;  %vm364_vm2 = vcmask 31744  }
   0xd   : > { %s797_s22 = sshll.u32 %s1098_s18, 1  ;;  %s833_s26 = sshll.u32 %s1098_s18, 6  ;;  %vm559_vm3 = vcmask 523264   ;;  %vm626_vm4 = vcmask 130048  }
   0xe   : > { %s285_s25 = scalar_lea.vmem %s1089_s2, %s797_s22  ;;  %s280_s29 = scalar_lea.vmem %s1087_s0, %s833_s26 }
   0xf   : > { %v345_v0 = vld [vmem:[%s285_s25] sm:$0x3]  ;;  %v994_v2 = vld [vmem:[%s280_s29 + $0x30] sm:$0xff]  ;;  %v996_v3 = vld [vmem:[%s280_s29 + $0x28] sm:$0xff]  ;;  %s846_s7 = smul.u32 12, %s1098_s18  ;;  %s299_s17 = scalar_lea.vmem %s1092_s5, %s833_s26 }
  0x10   : > { %348 = vxpose.xlu0.c.b16.start.end [1/1] (short) (narrow) %v345_v0, 64  ;;  %v992_v1 = vld [vmem:[%s280_s29 + $0x20] sm:$0xff]  ;;  %v1000_v5 = vld [vmem:[%s280_s29 + $0x38] sm:$0xff]  ;;  %v1004_v7 = vld [vmem:[%s280_s29 + $0x10] sm:$0xff] }
  0x11   : > { %v312_v4 = vpack.c.bf16 %v994_v2, %v992_v1  ;;  %v1002_v6 = vld [vmem:[%s280_s29] sm:$0xff]  ;;  %v313_v8 = vpack.c.bf16 %v1000_v5, %v996_v3  ;;  %v1008_v9 = vld [vmem:[%s280_s29 + $0x8] sm:$0xff]  ;;  %v1010_v10 = vld [vmem:[%s280_s29 + $0x18] sm:$0xff]  ;;  %s1055_s10 = scalar_lea.vmem %s1090_s3, %s846_s7 }
  0x12   : > { %v310_v11 = vpack.c.bf16 %v1004_v7, %v1002_v6  ;;  %v311_v12 = vpack.c.bf16 %v1010_v10, %v1008_v9 }
  0x13   : > { %325 = vmatpush.bf16.msra.mxu0 %v312_v4  ;;  %338 = vmatpush.bf16.msra.mxu1 %v313_v8 }
  0x17   : > { %326 = vmatpush.bf16.msra.mxu0 %v310_v11  ;;  %339 = vmatpush.bf16.msra.mxu1 %v311_v12 }
  0x1a   : > { %801 = vmatmul.msk.bf16.vlgmr.msra.gmra.mxu0 %vm315_vm0, %v314_v13  ;;  %802 = vmatmul.msk.bf16.vlgmr.msra.gmra.mxu1 %vm315_vm0, %v314_v13 }
  0x97   : > { %v328_v14 = vpop.f32.mrf.mxu0  ;;  %v341_v16 = vpop.f32.mrf.mxu1 }
  0x98   : > { %v346_v15 = vpack.c.bf16 %v328_v14, %v328_v14  ;;  %v347_v17 = vpack.c.bf16 %v341_v16, %v341_v16 }
  0x9a   : > { %v379_v18 = vsel %vm377_vm1, %v346_v15, 0  ;;  %v382_v19 = vsel %vm377_vm1, %v347_v17, 0 }
  0x9b   : > { %391 = vmatpush.bf16.msra.mxu2 %v379_v18  ;;  %420 = vmatpush.bf16.msra.mxu3 %v382_v19 }
  0x9f   : > { %v330_v20 = vpop.f32.mrf.mxu0  ;;  %v343_v21 = vpop.f32.mrf.mxu1 }
  0xbc   : > { %v356_v22 = vpop.trf.xlu0 }
  0xbd   : > { %803 = vmatmul.msk.bf16.vlgmr.msra.gmra.mxu2 %vm364_vm2, %v356_v22  ;;  %807 = vmatmul.msk.bf16.vlgmr.msra.gmra.mxu3 %vm364_vm2, %v356_v22 }
  0xcc   : > { %v357_v23 = vpop.trf.xlu0 }
  0xcd   : > { %804 = vmatmul.msk.bf16.gmra.mxu2 %vm364_vm2, %v357_v23  ;;  %808 = vmatmul.msk.bf16.gmra.mxu3 %vm364_vm2, %v357_v23 }
  0xdc   : > { %v358_v24 = vpop.trf.xlu0 }
  0xdd   : > { %805 = vmatmul.msk.bf16.gmra.mxu2 %vm364_vm2, %v358_v24  ;;  %809 = vmatmul.msk.bf16.gmra.mxu3 %vm364_vm2, %v358_v24 }
  0xec   : > { %v359_v25 = vpop.trf.xlu0 }
  0xed   : > { %806 = vmatmul.msk.bf16.gmra.mxu2 %vm364_vm2, %v359_v25  ;;  %810 = vmatmul.msk.bf16.gmra.mxu3 %vm364_vm2, %v359_v25 }
 0x140   : > { %v1019_v26 = vpop.f32.mrf.mxu2  ;;  %v1021_v27 = vpop.f32.mrf.mxu3 }
 0x148   : > { %v1023_v28 = vpop.f32.mrf.mxu2  ;;  %v1025_v29 = vpop.f32.mrf.mxu3 }
 0x150   : > { %v1027_v30 = vpop.f32.mrf.mxu2  ;;  %v1029_v31 = vpop.f32.mrf.mxu3 }
 0x151   : > { %v442_v40 = vmax.f32 %v1019_v26, %v1027_v30  ;;  %v455_v41 = vmax.f32 %v1021_v27, %v1029_v31 }
 0x158   : > { %v1031_v32 = vpop.f32.mrf.mxu2  ;;  %v1033_v33 = vpop.f32.mrf.mxu3 }
 0x159   : > { %v443_v42 = vmax.f32 %v1023_v28, %v1031_v32  ;;  %v456_v43 = vmax.f32 %v1025_v29, %v1033_v33 }
 0x160   : > { %v403_v34 = vpop.f32.mrf.mxu2  ;;  %v432_v35 = vpop.f32.mrf.mxu3 }
 0x161   : > { %v444_v44 = vmax.f32 %v442_v40, %v403_v34  ;;  %v457_v45 = vmax.f32 %v455_v41, %v432_v35 }
 0x168   : > { %v405_v36 = vpop.f32.mrf.mxu2  ;;  %v434_v37 = vpop.f32.mrf.mxu3 }
 0x169   : > { %v445_v46 = vmax.f32 %v443_v42, %v405_v36  ;;  %v458_v47 = vmax.f32 %v456_v43, %v434_v37 }
 0x170   : > { %v408_v38 = vpop.f32.mrf.mxu2  ;;  %v437_v39 = vpop.f32.mrf.mxu3 }
 0x171   : > { %v446_v50 = vmax.f32 %v444_v44, %v408_v38  ;;  %v459_v51 = vmax.f32 %v457_v45, %v437_v39 }
 0x178   : > { %v410_v48 = vpop.f32.mrf.mxu2  ;;  %v439_v49 = vpop.f32.mrf.mxu3 }
 0x179   : > { %v447_v52 = vmax.f32 %v445_v46, %v410_v48  ;;  %v460_v53 = vmax.f32 %v458_v47, %v439_v49 }
 0x17b   : > { %v448_v54 = vmax.f32 %v446_v50, %v447_v52  ;;  %v461_v55 = vmax.f32 %v459_v51, %v460_v53 }
 0x17d   : > { %v449_v56 = vrot.slane %v448_v54, 4  ;;  %v462_v57 = vrot.slane %v461_v55, 4 }
 0x17f   : > { %v450_v58 = vmax.f32 %v448_v54, %v449_v56  ;;  %v463_v59 = vmax.f32 %v461_v55, %v462_v57 }
 0x181   : > { %v451_v60 = vrot.slane %v450_v58, 2  ;;  %v464_v61 = vrot.slane %v463_v59, 2 }
 0x183   : > { %v452_v62 = vmax.f32 %v450_v58, %v451_v60  ;;  %v465_v63 = vmax.f32 %v463_v59, %v464_v61 }
 0x185   : > { %v453_v0 = vrot.slane %v452_v62, 1  ;;  %v466_v4 = vrot.slane %v465_v63, 1 }
 0x187   : > { %v454_v8 = vmax.f32 %v452_v62, %v453_v0  ;;  %v467_v11 = vmax.f32 %v465_v63, %v466_v4 }
 0x189   : > { %v480_v12 = vsub.f32 %v408_v38, %v454_v8  ;;  %v482_v13 = vsub.f32 %v410_v48, %v454_v8  ;;  %v481_v14 = vsub.f32 %v437_v39, %v467_v11  ;;  %v483_v15 = vsub.f32 %v439_v49, %v467_v11 }
 0x18a   : > { %v476_v16 = vsub.f32 %v403_v34, %v454_v8  ;;  %v478_v17 = vsub.f32 %v405_v36, %v454_v8  ;;  %v477_v18 = vsub.f32 %v432_v35, %v467_v11  ;;  %v479_v19 = vsub.f32 %v434_v37, %v467_v11 }
 0x18b   : > { %v490_v20 = vpack.c.bf16 %v482_v13, %v480_v12  ;;  %v491_v21 = vpack.c.bf16 %v483_v15, %v481_v14  ;;  %v472_v22 = vsub.f32 %v1027_v30, %v454_v8  ;;  %v474_v23 = vsub.f32 %v1031_v32, %v454_v8 }
 0x18c   : > { %v488_v24 = vpack.c.bf16 %v478_v17, %v476_v16  ;;  %v489_v25 = vpack.c.bf16 %v479_v19, %v477_v18  ;;  %v473_v40 = vsub.f32 %v1029_v31, %v467_v11  ;;  %v475_v41 = vsub.f32 %v1033_v33, %v467_v11 }
 0x18d   : > { %v504_v38 = vunpack.c.l.bf16 %v490_v20  ;;  %v506_v42 = vunpack.c.h.bf16 %v490_v20  ;;  %v505_v39 = vunpack.c.l.bf16 %v491_v21  ;;  %v507_v43 = vunpack.c.h.bf16 %v491_v21 }
 0x18e   : > { %v500_v34 = vunpack.c.l.bf16 %v488_v24  ;;  %v502_v36 = vunpack.c.h.bf16 %v488_v24  ;;  %v501_v35 = vunpack.c.l.bf16 %v489_v25  ;;  %v486_v46 = vpack.c.bf16 %v474_v23, %v472_v22 }
 0x18f   : > { %v532_v37 = vmul.f32 1.442695, %v504_v38  ;;  %v536_v44 = vmul.f32 1.442695, %v506_v42  ;;  %v534_v45 = vmul.f32 1.442695, %v505_v39  ;;  %v503_v47 = vunpack.c.h.bf16 %v489_v25 }
 0x190   : > { %v538_v30 = vmul.f32 1.442695, %v507_v43  ;;  %v487_v32 = vpack.c.bf16 %v475_v41, %v473_v40  ;;  %v524_v48 = vmul.f32 1.442695, %v500_v34  ;;  %v496_v49 = vunpack.c.l.bf16 %v486_v46  ;;  %v550_v25 = vld [vmem:[%s1055_s10 + $0x8] sm:$0x1] }
 0x191   : > { %872 = vpow2.f32 %v532_v37  ;;  %v528_v31 = vmul.f32 1.442695, %v502_v36  ;;  %v498_v33 = vunpack.c.h.bf16 %v486_v46  ;;  %v526_v51 = vmul.f32 1.442695, %v501_v35  ;;  %v835_v46 = vld [vmem:[%s1055_s10] sm:$0xff] }
 0x192   : > { %874 = vpow2.f32 %v536_v44  ;;  %v497_v50 = vunpack.c.l.bf16 %v487_v32  ;;  %v468_v52 = vsub.f32 %v1019_v26, %v454_v8  ;;  %v470_v53 = vsub.f32 %v1023_v28, %v454_v8 }
 0x193   : > { %876 = vpow2.f32 %v534_v45  ;;  %v530_v54 = vmul.f32 1.442695, %v503_v47  ;;  %v516_v55 = vmul.f32 1.442695, %v496_v49  ;;  %v499_v56 = vunpack.c.h.bf16 %v487_v32 }
 0x194   : > { %878 = vpow2.f32 %v538_v30  ;;  %v484_v57 = vpack.c.bf16 %v470_v53, %v468_v52  ;;  %v469_v58 = vsub.f32 %v1021_v27, %v467_v11  ;;  %v471_v59 = vsub.f32 %v1025_v29, %v467_v11 }
 0x195   : > { %880 = vpow2.f32 %v524_v48  ;;  %v520_v60 = vmul.f32 1.442695, %v498_v33  ;;  %v518_v61 = vmul.f32 1.442695, %v497_v50  ;;  %v522_v4 = vmul.f32 1.442695, %v499_v56 }
 0x196   : > { %882 = vpow2.f32 %v528_v31  ;;  %v492_v63 = vunpack.c.l.bf16 %v484_v57  ;;  %v494_v26 = vunpack.c.h.bf16 %v484_v57  ;;  %v485_v0 = vpack.c.bf16 %v471_v59, %v469_v58 }
 0x197   : > { %v873_v62 = vpop.eup %872  ;;  %884 = vpow2.f32 %v526_v51  ;;  %v556_v39 = vunpack.c.l.b16 %v550_v25 }
 0x198   : > { %v875_v28 = vpop.eup %874  ;;  %886 = vpow2.f32 %v530_v54  ;;  %v508_v13 = vmul.f32 1.442695, %v492_v63  ;;  %v512_v27 = vmul.f32 1.442695, %v494_v26  ;;  %v493_v29 = vunpack.c.l.bf16 %v485_v0  ;;  %v837_v63 = vld [vmem:[%s1091_s4 + $0x8] sm:$0xff] }
 0x199   : > { %v877_v8 = vpop.eup %876  ;;  %v546_v12 = vpack.c.bf16 %v875_v28, %v873_v62  ;;  %888 = vpow2.f32 %v516_v55  ;;  %v495_v11 = vunpack.c.h.bf16 %v485_v0  ;;  %v558_v45 = vpack.c.b16 %v556_v39, %v556_v39 }
 0x19a   : > { %v879_v14 = vpop.eup %878  ;;  %890 = vpow2.f32 %v520_v60  ;;  %v510_v18 = vmul.f32 1.442695, %v493_v29 }
 0x19b   : > { %v881_v15 = vpop.eup %880  ;;  %570 = vmatpush.bf16.msrb.mxu0 %v546_v12  ;;  %838 = vmatpush.bf16.msrb.mxu2 %v546_v12  ;;  %v547_v16 = vpack.c.bf16 %v879_v14, %v877_v8  ;;  %892 = vpow2.f32 %v518_v61  ;;  %v514_v19 = vmul.f32 1.442695, %v495_v11  ;;  %v836_v61 = vld [vmem:[%s1091_s4] sm:$0xff] }
 0x19c   : > { %v883_v17 = vpop.eup %882  ;;  %894 = vpow2.f32 %v522_v4 }
 0x19d   : > { %v885_v20 = vpop.eup %884  ;;  %588 = vmatpush.bf16.msrb.mxu1 %v547_v16  ;;  %842 = vmatpush.bf16.msrb.mxu3 %v547_v16  ;;  %v544_v21 = vpack.c.bf16 %v883_v17, %v881_v15  ;;  %896 = vpow2.f32 %v508_v13 }
 0x19e   : > { %v887_v22 = vpop.eup %886  ;;  %898 = vpow2.f32 %v512_v27 }
 0x19f   : > { %v889_v23 = vpop.eup %888  ;;  %571 = vmatpush.bf16.msrb.mxu0 %v544_v21  ;;  %839 = vmatpush.bf16.msrb.mxu2 %v544_v21  ;;  %v545_v24 = vpack.c.bf16 %v887_v22, %v885_v20  ;;  %900 = vpow2.f32 %v510_v18 }
 0x1a0   : > { %v891_v40 = vpop.eup %890  ;;  %902 = vpow2.f32 %v514_v19 }
 0x1a1   : > { %v893_v41 = vpop.eup %892  ;;  %589 = vmatpush.bf16.msrb.mxu1 %v545_v24  ;;  %843 = vmatpush.bf16.msrb.mxu3 %v545_v24  ;;  %v542_v38 = vpack.c.bf16 %v891_v40, %v889_v23 }
 0x1a2   : > { %v895_v42 = vpop.eup %894 }
 0x1a3   : > { %v897_v43 = vpop.eup %896  ;;  %572 = vmatpush.bf16.msrb.mxu0 %v542_v38  ;;  %840 = vmatpush.bf16.msrb.mxu2 %v542_v38  ;;  %v543_v34 = vpack.c.bf16 %v895_v42, %v893_v41 }
 0x1a4   : > { %v899_v36 = vpop.eup %898 }
 0x1a5   : > { %v901_v35 = vpop.eup %900  ;;  %590 = vmatpush.bf16.msrb.mxu1 %v543_v34  ;;  %844 = vmatpush.bf16.msrb.mxu3 %v543_v34  ;;  %v540_v37 = vpack.c.bf16 %v899_v36, %v897_v43 }
 0x1a6   : > { %v903_v44 = vpop.eup %902 }
 0x1a7   : > { %573 = vmatpush.bf16.msrb.mxu0 %v540_v37  ;;  %841 = vmatpush.bf16.msrb.mxu2 %v540_v37  ;;  %v541_v30 = vpack.c.bf16 %v903_v44, %v901_v35 }
 0x1a9   : > { %591 = vmatpush.bf16.msrb.mxu1 %v541_v30  ;;  %845 = vmatpush.bf16.msrb.mxu3 %v541_v30 }
 0x1aa   : > { %816 = vmatmul.msk.bf16.vlgmr.msrb.gmra.mxu2 %vm559_vm3, %v558_v45  ;;  %815 = vmatmul.msk.bf16.vlgmr.msrb.gmra.mxu0 %vm559_vm3, %v835_v46 }
 0x1ac   : > { %818 = vmatmul.msk.bf16.vlgmr.msrb.gmra.mxu3 %vm559_vm3, %v558_v45  ;;  %817 = vmatmul.msk.bf16.vlgmr.msrb.gmra.mxu1 %vm559_vm3, %v835_v46 }
 0x227   : > { %v575_v47 = vpop.f32.mrf.mxu0 }
 0x229   : > { %v593_v48 = vpop.f32.mrf.mxu1 }
 0x22d   : > { %v580_v32 = vpop.f32.mrf.mxu2 }
 0x22e   : > { %904 = vrcp.f32 %v580_v32 }
 0x22f   : > { %v598_v49 = vpop.f32.mrf.mxu3  ;;  %v577_v52 = vpop.f32.mrf.mxu0 }
 0x230   : > { %906 = vrcp.f32 %v598_v49 }
 0x231   : > { %v595_v57 = vpop.f32.mrf.mxu1 }
 0x234   : > { %v905_v31 = vpop.eup %904 }
 0x235   : > { %v604_v33 = vperm.slane %v905_v31, 0  ;;  %v582_v50 = vpop.f32.mrf.mxu2 }
 0x236   : > { %v907_v51 = vpop.eup %906 }
 0x237   : > { %v605_v53 = vperm.slane %v907_v51, 0  ;;  %v606_v54 = vmul.f32 %v604_v33, %v575_v47  ;;  %v600_v55 = vpop.f32.mrf.mxu3  ;;  %v608_v56 = vmul.f32 %v604_v33, %v577_v52 }
 0x239   : > { %v607_v58 = vmul.f32 %v605_v53, %v593_v48  ;;  %v614_v59 = vpack.c.bf16 %v608_v56, %v606_v54  ;;  %v609_v60 = vmul.f32 %v605_v53, %v595_v57 }
 0x23b   : > { %v615_v62 = vpack.c.bf16 %v609_v60, %v607_v58  ;;  %640 = vmatpush.bf16.msra.mxu0 %v614_v59 }
 0x23d   : > { %659 = vmatpush.bf16.msra.mxu1 %v615_v62 }
 0x23e   : > { %827 = vmatmul.msk.bf16.vlgmr.msra.gmra.mxu0 %vm626_vm4, %v836_v61 }
 0x240   : > { %829 = vmatmul.msk.bf16.vlgmr.msra.gmra.mxu1 %vm626_vm4, %v836_v61 }
 0x24e   : > { %828 = vmatmul.msk.bf16.gmra.mxu0 %vm626_vm4, %v837_v63 }
 0x250   : > { %830 = vmatmul.msk.bf16.gmra.mxu1 %vm626_vm4, %v837_v63 }
 0x2bb   : > { %v642_v26 = vpop.f32.mrf.mxu0 }
 0x2bc   : > { %v643_v0 = vadd.f32 %v642_v26, %v1002_v6 }
 0x2bd   : > { %v661_v28 = vpop.f32.mrf.mxu1 }
 0x2be   : > { %671 = vst [vmem:[%s299_s17] sm:$0xff] %v643_v0  ;;  %v662_v4 = vadd.f32 %v661_v28, %v1008_v9 }
 0x2c0   : > { %672 = vst [vmem:[%s299_s17 + $0x8] sm:$0xff] %v662_v4 }
 0x2c3   : > { %v644_v8 = vpop.f32.mrf.mxu0 }
 0x2c4   : > { %v645_v12 = vadd.f32 %v644_v8, %v1004_v7 }
 0x2c5   : > { %v663_v13 = vpop.f32.mrf.mxu1 }
 0x2c6   : > { %673 = vst [vmem:[%s299_s17 + $0x10] sm:$0xff] %v645_v12  ;;  %v664_v14 = vadd.f32 %v663_v13, %v1010_v10 }
 0x2c8   : > { %674 = vst [vmem:[%s299_s17 + $0x18] sm:$0xff] %v664_v14 }
 0x2cb   : > { %v647_v27 = vpop.f32.mrf.mxu0 }
 0x2cc   : > { %v648_v29 = vadd.f32 %v647_v27, %v992_v1 }
 0x2cd   : > { %v666_v11 = vpop.f32.mrf.mxu1 }
 0x2ce   : > { %675 = vst [vmem:[%s299_s17 + $0x20] sm:$0xff] %v648_v29  ;;  %v667_v6 = vadd.f32 %v666_v11, %v996_v3 }
 0x2d0   : > { %676 = vst [vmem:[%s299_s17 + $0x28] sm:$0xff] %v667_v6 }
 0x2d3   : > { %v649_v15 = vpop.f32.mrf.mxu0 }
 0x2d4   : > { %v650_v9 = vadd.f32 %v649_v15, %v994_v2 }
 0x2d5   : > { %v668_v16 = vpop.f32.mrf.mxu1 }
 0x2d6   : > { %677 = vst [vmem:[%s299_s17 + $0x30] sm:$0xff] %v650_v9  ;;  %v669_v7 = vadd.f32 %v668_v16, %v1000_v5 }
 0x2d8   : > { %678 = vst [vmem:[%s299_s17 + $0x38] sm:$0xff] %v669_v7 }
 0x2d9 PF: > { %s15_s20 = sadd.s32 1, %s930_s20   ;;  %s1093_s18 = smov %s926_s19 }
 0x2da   : > { %p12_p5 = scmp.ge.s32.totalorder %s15_s20, 4   ;;  %s1094_s19 = smov %s1096_s21 }
 0x2dc   :  { %14 = sbr.rel (!%p12_p5) target bundleno = 2 (0x2), region = 76 }

</bundles_post_ra>
